<compile_context>
chip_gen: v7x
topology: tpu7x:2x2x1
jax: 0.10.0
libtpu: 0.0.40
codegen_flags: <defaults>
</compile_context>

<pallas_src>
import jax
import jax.numpy as jnp
from jax.experimental import pallas as pl
from jax.experimental.pallas import tpu as pltpu


def _make_mlp_kernel(num_hidden, compute_dtype):
    def kernel(x_ref, *refs):
        o_ref = refs[-1]
        params = refs[:-1]          # [w0, b0, w1, b1, ..., w_out, b_out]

        h = x_ref[...]              # (in_dim, TB), batch on lanes, compute_dtype
        for l in range(num_hidden):
            w = params[2 * l][...]          # (out, in)  compute_dtype
            b = params[2 * l + 1][...]      # (out, 1)   f32 (BatchNorm folded in)
            acc = jnp.dot(w, h, preferred_element_type=jnp.float32)   # MXU, (out, TB) f32
            h = jnp.maximum(acc + b, 0.0)                             # VPU bias + ReLU, f32
            # The PyTorch module applies Dropout before each repeated (h2->h1) Linear;
            # in eval mode it is the identity, so nothing to do here.
            # TODO(synk): training-mode dropout would need pltpu.prng_seed +
            #             pltpu.prng_random_bits mask with 1/(1-p) scaling.
            if l + 1 < num_hidden:
                h = h.astype(compute_dtype)   # feed next MXU dot at native rate

        # Output Linear(h2 -> 1): VPU multiply + XLU sublane reduce -> lane-dense (1, TB).
        w_out = params[-2][...]     # (h2, 1) f32
        b_out = params[-1][...]     # (1, 1)  f32
        out = jnp.sum(h * w_out, axis=0, keepdims=True) + b_out
        o_ref[...] = out.astype(o_ref.dtype)

    return kernel


def _pick_batch_tile(batch, max_tile=1024):
    """Batch lives on the lane axis: round it up to a multiple of 128 lanes and tile at
    up to `max_tile` lanes per grid step (large tiles amortize per-step overhead; the
    weights are tiny, so VMEM stays far under the scoped limit)."""
    b128 = int(pl.cdiv(batch, 128)) * 128
    return min(b128, max_tile)


def mlp_dropout_pallas(x, hidden_wb, w_out, b_out, *, compute_dtype=jnp.float32):
    """x: (B, in_dim). hidden_wb: list of (W (out,in), b (out,1)) with BatchNorm folded in.
    w_out: (1, h2) (PyTorch layout), b_out: (1,). Returns (B, 1) float32."""
    B, in_dim = x.shape
    TB = _pick_batch_tile(B)
    B_pad = int(pl.cdiv(B, TB)) * TB
    num_tiles = B_pad // TB

    # Transpose once in the wrapper: batch -> lane axis (layout plumbing, outside the kernel).
    x_t = x.T.astype(compute_dtype)                       # (in_dim, B)
    if B_pad != B:
        x_t = jnp.pad(x_t, ((0, 0), (0, B_pad - B)))

    flat_params = []
    in_specs = [pl.BlockSpec((in_dim, TB), lambda i: (0, i))]      # streamed x tile
    for w, b in hidden_wb:
        wc = w.astype(compute_dtype)
        bc = b.astype(jnp.float32)
        flat_params += [wc, bc]
        in_specs += [pl.BlockSpec(wc.shape, lambda i: (0, 0)),     # VMEM-resident weights
                     pl.BlockSpec(bc.shape, lambda i: (0, 0))]
    w_out_c = jnp.asarray(w_out, jnp.float32).reshape(-1, 1)       # (h2, 1)
    b_out_c = jnp.asarray(b_out, jnp.float32).reshape(1, 1)        # (1, 1)
    flat_params += [w_out_c, b_out_c]
    in_specs += [pl.BlockSpec(w_out_c.shape, lambda i: (0, 0)),
                 pl.BlockSpec(b_out_c.shape, lambda i: (0, 0))]

    out = pl.pallas_call(
        _make_mlp_kernel(len(hidden_wb), compute_dtype),
        out_shape=jax.ShapeDtypeStruct((1, B_pad), jnp.float32),
        grid=(num_tiles,),
        in_specs=in_specs,
        out_specs=pl.BlockSpec((1, TB), lambda i: (0, i)),
        compiler_params=pltpu.CompilerParams(dimension_semantics=("parallel",)),
    )(x_t, *flat_params)
    return out[0, :B].reshape(B, 1)


def fold_bn_into_linear(w, b, gamma, beta, mean, var, eps=1e-5):
    """Fold eval-mode BatchNorm1d into the preceding Linear. w: (out,in), rest: (out,)."""
    scale = gamma / jnp.sqrt(var + eps)
    w_f = w * scale[:, None]
    b_f = (b - mean) * scale + beta
    return w_f, b_f.reshape(-1, 1)


def mlp_dropout_ref(x, layers, w_out, b_out, eps=1e-5):
    """Pure-JAX reference applying Linear/BatchNorm(eval)/ReLU explicitly; dropout = identity."""
    h = x
    for (w, b, gamma, beta, mean, var) in layers:
        h = h @ w.T + b
        h = (h - mean) * (gamma / jnp.sqrt(var + eps)) + beta
        h = jnp.maximum(h, 0.0)
    return h @ w_out.T + b_out


if __name__ == "__main__":
    # Small shapes consistent with the module: MLP_DropOut(32, 64, 32, dropout_prob=0.1, depth=1)
    batch, input_size, hidden_1, hidden_2, depth = 8, 32, 64, 32, 1

    key = jax.random.PRNGKey(0)
    dims = [(input_size, hidden_1), (hidden_1, hidden_2)] + \
           [(hidden_2, hidden_1), (hidden_1, hidden_2)] * depth

    layers = []   # PyTorch-native params: (W (out,in), b (out,), gamma, beta, run_mean, run_var)
    for (din, dout) in dims:
        key, kw, kb, kg, kbe, km, kv = jax.random.split(key, 7)
        w = jax.random.normal(kw, (dout, din), jnp.float32) * 0.1
        b = jax.random.normal(kb, (dout,), jnp.float32) * 0.1
        gamma = 1.0 + 0.1 * jax.random.normal(kg, (dout,), jnp.float32)
        beta = 0.1 * jax.random.normal(kbe, (dout,), jnp.float32)
        mean = 0.1 * jax.random.normal(km, (dout,), jnp.float32)
        var = jnp.abs(1.0 + 0.1 * jax.random.normal(kv, (dout,), jnp.float32))
        layers.append((w, b, gamma, beta, mean, var))

    key, kw, kb, kx = jax.random.split(key, 4)
    w_out = jax.random.normal(kw, (1, hidden_2), jnp.float32) * 0.1   # nn.Linear(h2, 1).weight
    b_out = jax.random.normal(kb, (1,), jnp.float32) * 0.1            # nn.Linear(h2, 1).bias
    x = jax.random.normal(kx, (batch, input_size), jnp.float32)

    # Fold eval-mode BatchNorm into the Linear layers for the fused kernel.
    hidden_wb = [fold_bn_into_linear(w, b, g, be, m, v) for (w, b, g, be, m, v) in layers]

    ref = mlp_dropout_ref(x, layers, w_out, b_out)

    # f32 path
    out_f32 = mlp_dropout_pallas(x, hidden_wb, w_out, b_out, compute_dtype=jnp.float32)
    jax.block_until_ready(out_f32)
    assert out_f32.shape == (batch, 1), out_f32.shape
    assert jnp.allclose(out_f32, ref, atol=1e-4, rtol=1e-4), "f32 kernel mismatch vs reference"

    # bf16 MXU-input path (f32 accumulation) for v6e/v7x bandwidth/MXU-rate win
    out_bf16 = mlp_dropout_pallas(x, hidden_wb, w_out, b_out, compute_dtype=jnp.bfloat16)
    jax.block_until_ready(out_bf16)
    assert out_bf16.shape == (batch, 1), out_bf16.shape
    assert jnp.allclose(out_bf16, ref, atol=5e-2, rtol=5e-2), "bf16 kernel mismatch vs reference"

    print("KERNEL_OK")
</pallas_src>

<mosaic_0001>
module attributes {stable_mosaic.version = 11 : i64} {
  func.func @kernel(%arg0: i32, %arg1: memref<32x128xf32, #tpu.memory_space<vmem>>, %arg2: memref<64x32xf32, #tpu.memory_space<vmem>>, %arg3: memref<64x1xf32, #tpu.memory_space<vmem>>, %arg4: memref<32x64xf32, #tpu.memory_space<vmem>>, %arg5: memref<32x1xf32, #tpu.memory_space<vmem>>, %arg6: memref<64x32xf32, #tpu.memory_space<vmem>>, %arg7: memref<64x1xf32, #tpu.memory_space<vmem>>, %arg8: memref<32x64xf32, #tpu.memory_space<vmem>>, %arg9: memref<32x1xf32, #tpu.memory_space<vmem>>, %arg10: memref<32x1xf32, #tpu.memory_space<vmem>>, %arg11: memref<1x1xf32, #tpu.memory_space<vmem>>, %arg12: memref<1x128xf32, #tpu.memory_space<vmem>>) attributes {dimension_semantics = [#tpu.dimension_semantics<parallel>], iteration_bounds = array<i64: 1>, scalar_prefetch = 0 : i64, scratch_operands = 0 : i64, tpu.core_type = #tpu.core_type<tc>, window_params = [{transform_indices = @transform_0, window_bounds = array<i64: 32, 128>}, {pipeline_mode = #tpu.pipeline_mode<synchronous>, transform_indices = @transform_1, window_bounds = array<i64: 64, 32>}, {pipeline_mode = #tpu.pipeline_mode<synchronous>, transform_indices = @transform_2, window_bounds = array<i64: 64, 1>}, {pipeline_mode = #tpu.pipeline_mode<synchronous>, transform_indices = @transform_3, window_bounds = array<i64: 32, 64>}, {pipeline_mode = #tpu.pipeline_mode<synchronous>, transform_indices = @transform_4, window_bounds = array<i64: 32, 1>}, {pipeline_mode = #tpu.pipeline_mode<synchronous>, transform_indices = @transform_5, window_bounds = array<i64: 64, 32>}, {pipeline_mode = #tpu.pipeline_mode<synchronous>, transform_indices = @transform_6, window_bounds = array<i64: 64, 1>}, {pipeline_mode = #tpu.pipeline_mode<synchronous>, transform_indices = @transform_7, window_bounds = array<i64: 32, 64>}, {pipeline_mode = #tpu.pipeline_mode<synchronous>, transform_indices = @transform_8, window_bounds = array<i64: 32, 1>}, {pipeline_mode = #tpu.pipeline_mode<synchronous>, transform_indices = @transform_9, window_bounds = array<i64: 32, 1>}, {pipeline_mode = #tpu.pipeline_mode<synchronous>, transform_indices = @transform_10, window_bounds = array<i64: 1, 1>}, {transform_indices = @transform_11, window_bounds = array<i64: 1, 128>}]} {
    %c0 = arith.constant 0 : index
    %c0_0 = arith.constant 0 : index
    %0 = vector.load %arg1[%c0, %c0_0] : memref<32x128xf32, #tpu.memory_space<vmem>>, vector<32x128xf32>
    %c0_1 = arith.constant 0 : index
    %c0_2 = arith.constant 0 : index
    %1 = vector.load %arg2[%c0_1, %c0_2] : memref<64x32xf32, #tpu.memory_space<vmem>>, vector<64x32xf32>
    %c0_3 = arith.constant 0 : index
    %c0_4 = arith.constant 0 : index
    %2 = vector.load %arg3[%c0_3, %c0_4] : memref<64x1xf32, #tpu.memory_space<vmem>>, vector<64x1xf32>
    %cst = arith.constant dense<0.000000e+00> : vector<64x128xf32>
    %3 = tpu.matmul %1, %0, %cst {dimension_numbers = #tpu.dot_dimension_numbers<[1], [0], [0], [1], [0, 0, 1, 1], [], []>} : vector<64x32xf32>, vector<32x128xf32>, vector<64x128xf32> -> vector<64x128xf32>
    %4 = vector.broadcast %2 : vector<64x1xf32> to vector<64x128xf32>
    %5 = arith.addf %3, %4 : vector<64x128xf32>
    %cst_5 = arith.constant 0.000000e+00 : f32
    %6 = vector.broadcast %cst_5 : f32 to vector<64x128xf32>
    %7 = arith.maximumf %5, %6 : vector<64x128xf32>
    %c0_6 = arith.constant 0 : index
    %c0_7 = arith.constant 0 : index
    %8 = vector.load %arg4[%c0_6, %c0_7] : memref<32x64xf32, #tpu.memory_space<vmem>>, vector<32x64xf32>
    %c0_8 = arith.constant 0 : index
    %c0_9 = arith.constant 0 : index
    %9 = vector.load %arg5[%c0_8, %c0_9] : memref<32x1xf32, #tpu.memory_space<vmem>>, vector<32x1xf32>
    %cst_10 = arith.constant dense<0.000000e+00> : vector<32x128xf32>
    %10 = tpu.matmul %8, %7, %cst_10 {dimension_numbers = #tpu.dot_dimension_numbers<[1], [0], [0], [1], [0, 0, 1, 1], [], []>} : vector<32x64xf32>, vector<64x128xf32>, vector<32x128xf32> -> vector<32x128xf32>
    %11 = vector.broadcast %9 : vector<32x1xf32> to vector<32x128xf32>
    %12 = arith.addf %10, %11 : vector<32x128xf32>
    %cst_11 = arith.constant 0.000000e+00 : f32
    %13 = vector.broadcast %cst_11 : f32 to vector<32x128xf32>
    %14 = arith.maximumf %12, %13 : vector<32x128xf32>
    %c0_12 = arith.constant 0 : index
    %c0_13 = arith.constant 0 : index
    %15 = vector.load %arg6[%c0_12, %c0_13] : memref<64x32xf32, #tpu.memory_space<vmem>>, vector<64x32xf32>
    %c0_14 = arith.constant 0 : index
    %c0_15 = arith.constant 0 : index
    %16 = vector.load %arg7[%c0_14, %c0_15] : memref<64x1xf32, #tpu.memory_space<vmem>>, vector<64x1xf32>
    %cst_16 = arith.constant dense<0.000000e+00> : vector<64x128xf32>
    %17 = tpu.matmul %15, %14, %cst_16 {dimension_numbers = #tpu.dot_dimension_numbers<[1], [0], [0], [1], [0, 0, 1, 1], [], []>} : vector<64x32xf32>, vector<32x128xf32>, vector<64x128xf32> -> vector<64x128xf32>
    %18 = vector.broadcast %16 : vector<64x1xf32> to vector<64x128xf32>
    %19 = arith.addf %17, %18 : vector<64x128xf32>
    %cst_17 = arith.constant 0.000000e+00 : f32
    %20 = vector.broadcast %cst_17 : f32 to vector<64x128xf32>
    %21 = arith.maximumf %19, %20 : vector<64x128xf32>
    %c0_18 = arith.constant 0 : index
    %c0_19 = arith.constant 0 : index
    %22 = vector.load %arg8[%c0_18, %c0_19] : memref<32x64xf32, #tpu.memory_space<vmem>>, vector<32x64xf32>
    %c0_20 = arith.constant 0 : index
    %c0_21 = arith.constant 0 : index
    %23 = vector.load %arg9[%c0_20, %c0_21] : memref<32x1xf32, #tpu.memory_space<vmem>>, vector<32x1xf32>
    %cst_22 = arith.constant dense<0.000000e+00> : vector<32x128xf32>
    %24 = tpu.matmul %22, %21, %cst_22 {dimension_numbers = #tpu.dot_dimension_numbers<[1], [0], [0], [1], [0, 0, 1, 1], [], []>} : vector<32x64xf32>, vector<64x128xf32>, vector<32x128xf32> -> vector<32x128xf32>
    %25 = vector.broadcast %23 : vector<32x1xf32> to vector<32x128xf32>
    %26 = arith.addf %24, %25 : vector<32x128xf32>
    %cst_23 = arith.constant 0.000000e+00 : f32
    %27 = vector.broadcast %cst_23 : f32 to vector<32x128xf32>
    %28 = arith.maximumf %26, %27 : vector<32x128xf32>
    %c0_24 = arith.constant 0 : index
    %c0_25 = arith.constant 0 : index
    %29 = vector.load %arg10[%c0_24, %c0_25] : memref<32x1xf32, #tpu.memory_space<vmem>>, vector<32x1xf32>
    %c0_26 = arith.constant 0 : index
    %c0_27 = arith.constant 0 : index
    %30 = vector.load %arg11[%c0_26, %c0_27] : memref<1x1xf32, #tpu.memory_space<vmem>>, vector<1x1xf32>
    %31 = vector.broadcast %29 : vector<32x1xf32> to vector<32x128xf32>
    %32 = arith.mulf %28, %31 : vector<32x128xf32>
    %cst_28 = arith.constant dense<0.000000e+00> : vector<128xf32>
    %33 = vector.multi_reduction <add>, %32, %cst_28 [0] : vector<32x128xf32> to vector<128xf32>
    %34 = vector.shape_cast %33 : vector<128xf32> to vector<1x128xf32>
    %35 = vector.broadcast %30 : vector<1x1xf32> to vector<1x128xf32>
    %36 = arith.addf %34, %35 : vector<1x128xf32>
    %c0_29 = arith.constant 0 : index
    %c0_30 = arith.constant 0 : index
    %37 = vector.load %arg12[%c0_29, %c0_30] : memref<1x128xf32, #tpu.memory_space<vmem>>, vector<1x128xf32>
    tpu.vector_store %arg12[%c0_29, %c0_30], %36 {strides = array<i32>} : memref<1x128xf32, #tpu.memory_space<vmem>>, vector<1x128xf32>,
    return
  }
  func.func @transform_0(%arg0: i32) -> (i32, i32) {
    %c0_i32 = arith.constant 0 : i32
    %c0_i32_0 = arith.constant 0 : i32
    return %c0_i32, %arg0 : i32, i32
  }
  func.func @transform_1(%arg0: i32) -> (i32, i32) {
    %c0_i32 = arith.constant 0 : i32
    %c0_i32_0 = arith.constant 0 : i32
    %c0_i32_1 = arith.constant 0 : i32
    return %c0_i32, %c0_i32_0 : i32, i32
  }
  func.func @transform_2(%arg0: i32) -> (i32, i32) {
    %c0_i32 = arith.constant 0 : i32
    %c0_i32_0 = arith.constant 0 : i32
    %c0_i32_1 = arith.constant 0 : i32
    return %c0_i32, %c0_i32_0 : i32, i32
  }
  func.func @transform_3(%arg0: i32) -> (i32, i32) {
    %c0_i32 = arith.constant 0 : i32
    %c0_i32_0 = arith.constant 0 : i32
    %c0_i32_1 = arith.constant 0 : i32
    return %c0_i32, %c0_i32_0 : i32, i32
  }
  func.func @transform_4(%arg0: i32) -> (i32, i32) {
    %c0_i32 = arith.constant 0 : i32
    %c0_i32_0 = arith.constant 0 : i32
    %c0_i32_1 = arith.constant 0 : i32
    return %c0_i32, %c0_i32_0 : i32, i32
  }
  func.func @transform_5(%arg0: i32) -> (i32, i32) {
    %c0_i32 = arith.constant 0 : i32
    %c0_i32_0 = arith.constant 0 : i32
    %c0_i32_1 = arith.constant 0 : i32
    return %c0_i32, %c0_i32_0 : i32, i32
  }
  func.func @transform_6(%arg0: i32) -> (i32, i32) {
    %c0_i32 = arith.constant 0 : i32
    %c0_i32_0 = arith.constant 0 : i32
    %c0_i32_1 = arith.constant 0 : i32
    return %c0_i32, %c0_i32_0 : i32, i32
  }
  func.func @transform_7(%arg0: i32) -> (i32, i32) {
    %c0_i32 = arith.constant 0 : i32
    %c0_i32_0 = arith.constant 0 : i32
    %c0_i32_1 = arith.constant 0 : i32
    return %c0_i32, %c0_i32_0 : i32, i32
  }
  func.func @transform_8(%arg0: i32) -> (i32, i32) {
    %c0_i32 = arith.constant 0 : i32
    %c0_i32_0 = arith.constant 0 : i32
    %c0_i32_1 = arith.constant 0 : i32
    return %c0_i32, %c0_i32_0 : i32, i32
  }
  func.func @transform_9(%arg0: i32) -> (i32, i32) {
    %c0_i32 = arith.constant 0 : i32
    %c0_i32_0 = arith.constant 0 : i32
    %c0_i32_1 = arith.constant 0 : i32
    return %c0_i32, %c0_i32_0 : i32, i32
  }
  func.func @transform_10(%arg0: i32) -> (i32, i32) {
    %c0_i32 = arith.constant 0 : i32
    %c0_i32_0 = arith.constant 0 : i32
    %c0_i32_1 = arith.constant 0 : i32
    return %c0_i32, %c0_i32_0 : i32, i32
  }
  func.func @transform_11(%arg0: i32) -> (i32, i32) {
    %c0_i32 = arith.constant 0 : i32
    %c0_i32_0 = arith.constant 0 : i32
    return %c0_i32, %arg0 : i32, i32
  }
}

</mosaic_0001>

<bundles_post_ra>
// kernel: tpu_custom_call.1
= control target key start
LH: loop header
LB: loop body
LE: loop exit
PB: predicated region body
PF: predicated region fallthrough
CT: control target
= control target key end

     0   :  { %s1255_s0 = inlined_call_operand.vmem [shape: f32[32,128], index: 0, kind: input, shape index: {}]   ;;  %s1256_s1 = inlined_call_operand.vmem [shape: f32[64,32], index: 1, kind: input, shape index: {}]   ;;  %s1257_s2 = inlined_call_operand.vmem [shape: f32[64,1], index: 2, kind: input, shape index: {}]   ;;  %s1258_s3 = inlined_call_operand.vmem [shape: f32[32,64], index: 3, kind: input, shape index: {}]   ;;  %s1259_s4 = inlined_call_operand.vmem [shape: f32[32,1], index: 4, kind: input, shape index: {}]   ;;  %s1260_s5 = inlined_call_operand.vmem [shape: f32[64,32], index: 5, kind: input, shape index: {}]   ;;  %s1261_s6 = inlined_call_operand.vmem [shape: f32[64,1], index: 6, kind: input, shape index: {}]   ;;  %s1262_s7 = inlined_call_operand.vmem [shape: f32[32,64], index: 7, kind: input, shape index: {}]   ;;  %s1263_s8 = inlined_call_operand.vmem [shape: f32[32,1], index: 8, kind: input, shape index: {}]   ;;  %s1264_s9 = inlined_call_operand.vmem [shape: f32[32,1], index: 9, kind: input, shape index: {}]   ;;  %s1265_s10 = inlined_call_operand.<no memory space> [shape: f32[1,1], index: 10, kind: input, shape index: {}]   ;;  %s1266_s11 = inlined_call_operand.hbm [shape: f32[1,128], index: 11, kind: output, shape index: {}]  }
   0x1   :  { %v16_v0 = vstv %s1265_s10 }
   0x2   :  { %17 = vst [vmem:[#allocation2] sm:$0x1] %v16_v0 }
   0x3   :  { %v41_v1 = vld [vmem:[%s1255_s0] sm:$0xff]  ;;  %v42_v2 = vld [vmem:[%s1255_s0 + $0x8] sm:$0xff]  ;;  %v43_v3 = vld [vmem:[%s1255_s0 + $0x10] sm:$0xff]  ;;  %vm101_vm0 = vcmask 261120   ;;  %v986_v7 = vmov 0  }
   0x4   :  { %v910_v4 = vpack.c.bf16 %v42_v2, %v41_v1  ;;  %v44_v5 = vld [vmem:[%s1255_s0 + $0x18] sm:$0xff]  ;;  %v45_v6 = vld [vmem:[%s1256_s1] sm:$0xff]  ;;  %960 = vset.pattern.permute.xlu0 %v986_v7  ;;  %961 = vset.pattern.permute.xlu1 %v986_v7  ;;  %v55_v10 = vld [vmem:[%s1257_s2 + $0x10] sm:$0xff] }
   0x5   :  { %v914_v8 = vpack.c.bf16 %v44_v5, %v43_v3  ;;  %834 = vmatprep.mubr.msk.f32.mxu0 %vm101_vm0, %v45_v6  ;;  %v53_v9 = vld [vmem:[%s1257_s2] sm:$0xff]  ;;  %v54_v11 = vld [vmem:[%s1257_s2 + $0x8] sm:$0xff]  ;;  %73 = vperm.xlu1 %961, %v55_v10   ;;  %v56_v12 = vld [vmem:[%s1257_s2 + $0x18] sm:$0xff] }
   0x6   :  { %911 = vmatprep.subr.bf16.mxu0 %v910_v4  ;;  %63 = vperm.xlu0 %960, %v53_v9   ;;  %v46_v13 = vld [vmem:[%s1256_s1 + $0x8] sm:$0xff]  ;;  %v47_v14 = vld [vmem:[%s1256_s1 + $0x10] sm:$0xff]  ;;  %v57_v15 = vld [vmem:[%s1257_s2 + $0x20] sm:$0xff] }
   0x7   :  { %913 = vmatpush3.bf16.msra.mxu0 %v910_v4  ;;  %v58_v16 = vld [vmem:[%s1257_s2 + $0x28] sm:$0xff]  ;;  %v48_v17 = vld [vmem:[%s1256_s1 + $0x18] sm:$0xff]  ;;  %v49_v18 = vld [vmem:[%s1256_s1 + $0x20] sm:$0xff] }
   0x8   :  { %915 = vmatprep.subr.bf16.mxu0 %v914_v8 }
   0x9   :  { %78 = vperm.xlu1 %961, %v56_v12  }
   0xa   :  { %68 = vperm.xlu0 %960, %v54_v11  }
   0xb   :  { %917 = vmatpush3.bf16.msra.mxu0 %v914_v8 }
   0xe   :  { %835 = vmatmul.mubr.msk.f32.vlgmr.msra.gmra.mrb[0].mxu0 %vm101_vm0, %v46_v13  ;;  %83 = vperm.xlu0 %960, %v57_v15  }
   0xf   :  { %837 = vmatprep.mubr.msk.f32.mxu0 %vm101_vm0, %v47_v14 }
  0x10   :  { %18 = vsyncpa [#allocation4], 0  ;;  %v59_v19 = vld [vmem:[%s1257_s2 + $0x30] sm:$0xff]  ;;  %88 = vperm.xlu1 %961, %v58_v16   ;;  %v60_v20 = vld [vmem:[%s1257_s2 + $0x38] sm:$0xff]  ;;  %vm267_vm1 = vcmask 523264  }
  0x11   :  { %v50_v21 = vld [vmem:[%s1256_s1 + $0x28] sm:$0xff]  ;;  %v51_v22 = vld [vmem:[%s1256_s1 + $0x30] sm:$0xff]  ;;  %v243_v23 = vld [vmem:[%s1259_s4] sm:$0xff] }
  0x12   :  { %838 = vmatmul.mubr.msk.f32.gmra.mrb[2].mxu0 %vm101_vm0, %v48_v17  ;;  %93 = vperm.xlu0 %960, %v59_v19   ;;  %v244_v24 = vld [vmem:[%s1259_s4 + $0x8] sm:$0xff]  ;;  %v52_v25 = vld [vmem:[%s1256_s1 + $0x38] sm:$0xff]  ;;  %v245_v26 = vld [vmem:[%s1259_s4 + $0x10] sm:$0xff] }
  0x13   :  { %840 = vmatprep.mubr.msk.f32.mxu0 %vm101_vm0, %v49_v18  ;;  %v246_v27 = vld [vmem:[%s1259_s4 + $0x18] sm:$0xff]  ;;  %v377_v28 = vld [vmem:[%s1261_s6] sm:$0xff]  ;;  %v378_v29 = vld [vmem:[%s1261_s6 + $0x8] sm:$0xff] }
  0x14   :  { %98 = vperm.xlu1 %961, %v60_v20   ;;  %v379_v30 = vld [vmem:[%s1261_s6 + $0x10] sm:$0xff]  ;;  %v380_v31 = vld [vmem:[%s1261_s6 + $0x18] sm:$0xff]  ;;  %v381_v32 = vld [vmem:[%s1261_s6 + $0x20] sm:$0xff] }
  0x15   :  { %v382_v33 = vld [vmem:[%s1261_s6 + $0x28] sm:$0xff]  ;;  %v383_v34 = vld [vmem:[%s1261_s6 + $0x30] sm:$0xff]  ;;  %v384_v35 = vld [vmem:[%s1261_s6 + $0x38] sm:$0xff] }
  0x16   :  { %841 = vmatmul.mubr.msk.f32.gmra.mrb[4].mxu0 %vm101_vm0, %v50_v21  ;;  %249 = vperm.xlu0 %960, %v243_v23   ;;  %v566_v36 = vld [vmem:[%s1263_s8] sm:$0xff]  ;;  %v567_v37 = vld [vmem:[%s1263_s8 + $0x8] sm:$0xff]  ;;  %v568_v38 = vld [vmem:[%s1263_s8 + $0x10] sm:$0xff] }
  0x17   :  { %843 = vmatprep.mubr.msk.f32.mxu0 %vm101_vm0, %v51_v22  ;;  %v569_v39 = vld [vmem:[%s1263_s8 + $0x18] sm:$0xff]  ;;  %v691_v40 = vld [vmem:[%s1264_s9] sm:$0xff]  ;;  %v692_v41 = vld [vmem:[%s1264_s9 + $0x8] sm:$0xff] }
  0x18   :  { %254 = vperm.xlu1 %961, %v244_v24   ;;  %v693_v42 = vld [vmem:[%s1264_s9 + $0x10] sm:$0xff]  ;;  %v694_v43 = vld [vmem:[%s1264_s9 + $0x18] sm:$0xff]  ;;  %v695_v44 = vld [vmem:[#allocation2] sm:$0x1] }
  0x19   :  { %v239_v45 = vld [vmem:[%s1258_s3] sm:$0xff]  ;;  %v240_v18 = vld [vmem:[%s1258_s3 + $0x8] sm:$0xff]  ;;  %v241_v19 = vld [vmem:[%s1258_s3 + $0x10] sm:$0xff] }
  0x1a   :  { %844 = vmatmul.mubr.msk.f32.gmra.mrb[6].mxu0 %vm101_vm0, %v52_v25  ;;  %259 = vperm.xlu0 %960, %v245_v26   ;;  %v242_v20 = vld [vmem:[%s1258_s3 + $0x18] sm:$0xff]  ;;  %v369_v21 = vld [vmem:[%s1260_s5] sm:$0xff] }
  0x1b   :  { %862 = vmatprep.mubr.msk.f32.mxu1 %vm267_vm1, %v239_v45  ;;  %876 = vmatprep.mubr.msk.f32.mxu0 %vm101_vm0, %v369_v21  ;;  %v375_v45 = vld [vmem:[%s1260_s5 + $0x30] sm:$0xff] }
  0x1c   :  { %264 = vperm.xlu1 %961, %v246_v27   ;;  %v564_v21 = vld [vmem:[%s1262_s7 + $0x10] sm:$0xff] }
  0x1e   :  { %387 = vperm.xlu0 %960, %v377_v28  }
  0x20   :  { %392 = vperm.xlu1 %961, %v378_v29  }
  0x22   :  { %397 = vperm.xlu0 %960, %v379_v30  }
  0x24   :  { %402 = vperm.xlu1 %961, %v380_v31  }
  0x26   :  { %407 = vperm.xlu0 %960, %v381_v32  }
  0x28   :  { %412 = vperm.xlu1 %961, %v382_v33  }
  0x2a   :  { %417 = vperm.xlu0 %960, %v383_v34  }
  0x2c   :  { %422 = vperm.xlu1 %961, %v384_v35  }
  0x2e   :  { %572 = vperm.xlu0 %960, %v566_v36  }
  0x30   :  { %577 = vperm.xlu1 %961, %v567_v37  }
  0x32   :  { %582 = vperm.xlu0 %960, %v568_v38  }
  0x34   :  { %587 = vperm.xlu1 %961, %v569_v39  }
  0x36   :  { %698 = vperm.xlu0 %960, %v691_v40   ;;  %v370_v40 = vld [vmem:[%s1260_s5 + $0x8] sm:$0xff] }
  0x38   :  { %703 = vperm.xlu1 %961, %v692_v41   ;;  %v371_v41 = vld [vmem:[%s1260_s5 + $0x10] sm:$0xff] }
  0x3a   :  { %708 = vperm.xlu0 %960, %v693_v42   ;;  %v372_v42 = vld [vmem:[%s1260_s5 + $0x18] sm:$0xff] }
  0x3c   :  { %713 = vperm.xlu1 %961, %v694_v43   ;;  %v373_v43 = vld [vmem:[%s1260_s5 + $0x20] sm:$0xff] }
  0x3e   :  { %731 = vperm.xlu0 %960, %v695_v44   ;;  %v374_v44 = vld [vmem:[%s1260_s5 + $0x28] sm:$0xff] }
  0x84   :  { %v74_v47 = vpop.permute.xlu1 %73 }
  0x85   :  { %v64_v46 = vpop.permute.xlu0 %63 }
  0x88   :  { %v79_v49 = vpop.permute.xlu1 %78 }
  0x89   :  { %v69_v48 = vpop.permute.xlu0 %68 }
  0x8d   :  { %v84_v62 = vpop.permute.xlu0 %83 }
  0x8f   :  { %v89_v59 = vpop.permute.xlu1 %88 }
  0x91   :  { %v94_v10 = vpop.permute.xlu0 %93 }
  0x93   :  { %v99_v7 = vpop.permute.xlu1 %98 }
  0x95   :  { %v250_v23 = vpop.permute.xlu0 %249 }
  0x97   :  { %v255_v22 = vpop.permute.xlu1 %254 }
  0x99   :  { %v260_v32 = vpop.permute.xlu0 %259 }
  0x9b   :  { %v265_v29 = vpop.permute.xlu1 %264 }
  0xe1   :  { %v836_v50 = vpop.f32.mrb[0].mxu0 }
  0xe2   :  { %v198_v51 = vadd.f32 %v836_v50, %v69_v48  ;;  %v192_v52 = vpop.f32.mrb[1].mxu0  ;;  %v393_v48 = vpop.permute.xlu1 %392 }
  0xe3   :  { %v193_v53 = vadd.f32 %v192_v52, %v64_v46  ;;  %v376_v46 = vld [vmem:[%s1260_s5 + $0x38] sm:$0xff] }
  0xe4   :  { %v232_v54 = vmax.f32 %v198_v51, 0.0 }
  0xe5   :  { %v231_v55 = vmax.f32 %v193_v53, 0.0  ;;  %v839_v56 = vpop.f32.mrb[2].mxu0 }
  0xe6   :  { %v208_v57 = vadd.f32 %v839_v56, %v79_v49  ;;  %v202_v58 = vpop.f32.mrb[3].mxu0  ;;  %v388_v49 = vpop.permute.xlu0 %387 }
  0xe7   :  { %v203_v60 = vadd.f32 %v202_v58, %v74_v47  ;;  %v918_v61 = vpack.c.bf16 %v232_v54, %v231_v55  ;;  %v562_v47 = vld [vmem:[%s1262_s7] sm:$0xff]  ;;  %v403_v50 = vpop.permute.xlu1 %402 }
  0xe8   :  { %v234_v63 = vmax.f32 %v208_v57, 0.0 }
  0xe9   :  { %v233_v0 = vmax.f32 %v203_v60, 0.0  ;;  %v842_v1 = vpop.f32.mrb[4].mxu0  ;;  %919 = vmatprep.subr.bf16.mxu1 %v918_v61 }
  0xea   :  { %v218_v2 = vadd.f32 %v842_v1, %v89_v59  ;;  %v212_v3 = vpop.f32.mrb[5].mxu0  ;;  %921 = vmatpush3.bf16.msra.mxu1 %v918_v61  ;;  %v398_v52 = vpop.permute.xlu0 %397 }
  0xeb   :  { %v922_v4 = vpack.c.bf16 %v234_v63, %v233_v0  ;;  %v213_v5 = vadd.f32 %v212_v3, %v84_v62  ;;  %v413_v61 = vpop.permute.xlu1 %412 }
  0xec   :  { %v236_v6 = vmax.f32 %v218_v2, 0.0 }
  0xed   :  { %v235_v8 = vmax.f32 %v213_v5, 0.0  ;;  %v845_v9 = vpop.f32.mrb[6].mxu0  ;;  %923 = vmatprep.subr.bf16.mxu1 %v922_v4 }
  0xee   :  { %v228_v11 = vadd.f32 %v845_v9, %v99_v7  ;;  %v222_v12 = vpop.f32.mrb[7].mxu0  ;;  %925 = vmatpush3.bf16.msra.mxu1 %v922_v4  ;;  %v408_v0 = vpop.permute.xlu0 %407 }
  0xef   :  { %v926_v13 = vpack.c.bf16 %v236_v6, %v235_v8  ;;  %v223_v14 = vadd.f32 %v222_v12, %v94_v10  ;;  %v423_v9 = vpop.permute.xlu1 %422 }
  0xf0   :  { %v238_v15 = vmax.f32 %v228_v11, 0.0 }
  0xf1   :  { %v237_v16 = vmax.f32 %v223_v14, 0.0  ;;  %927 = vmatprep.subr.bf16.mxu1 %v926_v13 }
  0xf2   :  { %929 = vmatpush3.bf16.msra.mxu1 %v926_v13  ;;  %v418_v12 = vpop.permute.xlu0 %417 }
  0xf3   :  { %v930_v17 = vpack.c.bf16 %v238_v15, %v237_v16 }
  0xf5   :  { %931 = vmatprep.subr.bf16.mxu1 %v930_v17 }
  0xf6   :  { %933 = vmatpush3.bf16.msra.mxu1 %v930_v17 }
  0xf9   :  { %863 = vmatmul.mubr.msk.f32.vlgmr.msra.gmra.mrb[0].mxu1 %vm267_vm1, %v240_v18 }
  0xfa   :  { %865 = vmatprep.mubr.msk.f32.mxu1 %vm267_vm1, %v241_v19 }
  0xfd   :  { %866 = vmatmul.mubr.msk.f32.gmra.mrb[2].mxu1 %vm267_vm1, %v242_v20  ;;  %v563_v20 = vld [vmem:[%s1262_s7 + $0x8] sm:$0xff] }
  0xfe   :  { %904 = vmatprep.mubr.msk.f32.mxu1 %vm267_vm1, %v562_v47 }
 0x1cc   :  { %v864_v24 = vpop.f32.mrb[0].mxu1 }
 0x1cd   :  { %v352_v25 = vadd.f32 %v864_v24, %v255_v22  ;;  %v346_v26 = vpop.f32.mrb[1].mxu1  ;;  %v565_v22 = vld [vmem:[%s1262_s7 + $0x18] sm:$0xff]  ;;  %v578_v24 = vpop.permute.xlu1 %577  ;;  %s987_s7 = smov [#allocation3]  }
 0x1ce   :  { %v347_v27 = vadd.f32 %v346_v26, %v250_v23  ;;  %v573_v23 = vpop.permute.xlu0 %572  ;;  %s746_s4 = sshll.u32 %s987_s7, 4  ;;  %s747_s4 = int_to_ptr.vmem [resolvable:$true] %s746_s4 }
 0x1cf   :  { %v366_v28 = vmax.f32 %v352_v25, 0.0  ;;  %s962_s30 = scalar_lea.vmem %s747_s4, 16  ;;  %s966_s12 = scalar_lea.vmem %s747_s4, 32 }
 0x1d0   :  { %v365_v30 = vmax.f32 %v347_v27, 0.0  ;;  %v867_v31 = vpop.f32.mrb[2].mxu1  ;;  %p963_p0 = scmp.ne.s32.totalorder %s747_s4, %s962_s30  ;;  %p967_p1 = scmp.lt.s32.totalorder %s747_s4, %s747_s4 }
 0x1d1   :  { %v362_v33 = vadd.f32 %v867_v31, %v265_v29  ;;  %v356_v34 = vpop.f32.mrb[3].mxu1  ;;  %v588_v26 = vpop.permute.xlu1 %587  ;;  %p968_p2 = scmp.lt.s32.totalorder %s966_s12, %s962_s30 }
 0x1d2   :  { %v934_v35 = vpack.c.bf16 %v366_v28, %v365_v30  ;;  %v357_v36 = vadd.f32 %v356_v34, %v260_v32  ;;  %v583_v25 = vpop.permute.xlu0 %582 }
 0x1d3   :  { %v368_v37 = vmax.f32 %v362_v33, 0.0  ;;  %p969_p3 = por %p968_p2, %p967_p1 }
 0x1d4   :  { %v367_v38 = vmax.f32 %v357_v36, 0.0  ;;  %935 = vmatprep.subr.bf16.mxu0 %v934_v35 }
 0x1d5   :  { %937 = vmatpush3.bf16.msra.mxu0 %v934_v35  ;;  %v704_v33 = vpop.permute.xlu1 %703  ;;  %p970_p4 = pnand %p969_p3, %p963_p0 }
 0x1d6   :  { %v938_v39 = vpack.c.bf16 %v368_v37, %v367_v38  ;;  %v699_v31 = vpop.permute.xlu0 %698 }
 0x1d8   :  { %939 = vmatprep.subr.bf16.mxu0 %v938_v39 }
 0x1d9   :  { %941 = vmatpush3.bf16.msra.mxu0 %v938_v39 }
 0x1dc   :  { %877 = vmatmul.mubr.msk.f32.vlgmr.msra.gmra.mrb[8].mxu0 %vm101_vm0, %v370_v40 }
 0x1dd   :  { %879 = vmatprep.mubr.msk.f32.mxu0 %vm101_vm0, %v371_v41 }
 0x1e0   :  { %880 = vmatmul.mubr.msk.f32.gmra.mrb[10].mxu0 %vm101_vm0, %v372_v42 }
 0x1e1   :  { %882 = vmatprep.mubr.msk.f32.mxu0 %vm101_vm0, %v373_v43 }
 0x1e4   :  { %883 = vmatmul.mubr.msk.f32.gmra.mrb[12].mxu0 %vm101_vm0, %v374_v44  ;;  %v709_v44 = vpop.permute.xlu0 %708 }
 0x1e5   :  { %885 = vmatprep.mubr.msk.f32.mxu0 %vm101_vm0, %v375_v45 }
 0x1e8   :  { %886 = vmatmul.mubr.msk.f32.gmra.mrb[14].mxu0 %vm101_vm0, %v376_v46  ;;  %v714_v46 = vpop.permute.xlu1 %713 }
 0x2af   :  { %v878_v51 = vpop.f32.mrb[8].mxu0 }
 0x2b0   :  { %v521_v53 = vadd.f32 %v878_v51, %v393_v48  ;;  %v515_v54 = vpop.f32.mrb[9].mxu0 }
 0x2b1   :  { %v516_v55 = vadd.f32 %v515_v54, %v388_v49  ;;  %v734_v49 = vlaneseq }
 0x2b2   :  { %v555_v56 = vmax.f32 %v521_v53, 0.0 }
 0x2b3   :  { %v554_v57 = vmax.f32 %v516_v55, 0.0  ;;  %v881_v58 = vpop.f32.mrb[10].mxu0 }
 0x2b4   :  { %v531_v59 = vadd.f32 %v881_v58, %v403_v50  ;;  %v525_v60 = vpop.f32.mrb[11].mxu0 }
 0x2b5   :  { %v942_v62 = vpack.c.bf16 %v555_v56, %v554_v57  ;;  %v526_v63 = vadd.f32 %v525_v60, %v398_v52  ;;  %v735_v52 = vshrl.u32 %v734_v49, 7  ;;  %v732_v57 = vpop.permute.xlu0 %731 }
 0x2b6   :  { %v557_v1 = vmax.f32 %v531_v59, 0.0 }
 0x2b7   :  { %v556_v2 = vmax.f32 %v526_v63, 0.0  ;;  %v884_v3 = vpop.f32.mrb[12].mxu0  ;;  %943 = vmatprep.subr.bf16.mxu1 %v942_v62  ;;  %v736_v55 = vsub.s32 0, %v735_v52 }
 0x2b8   :  { %v541_v4 = vadd.f32 %v884_v3, %v413_v61  ;;  %v535_v5 = vpop.f32.mrb[13].mxu0  ;;  %945 = vmatpush3.bf16.msra.mxu1 %v942_v62 }
 0x2b9   :  { %v946_v6 = vpack.c.bf16 %v557_v1, %v556_v2  ;;  %v536_v7 = vadd.f32 %v535_v5, %v408_v0  ;;  %v737_v59 = vrot.slane %v732_v57, %v736_v55 }
 0x2ba   :  { %v559_v8 = vmax.f32 %v541_v4, 0.0 }
 0x2bb   :  { %v558_v10 = vmax.f32 %v536_v7, 0.0  ;;  %v887_v11 = vpop.f32.mrb[14].mxu0  ;;  %947 = vmatprep.subr.bf16.mxu1 %v946_v6 }
 0x2bc   :  { %v551_v13 = vadd.f32 %v887_v11, %v423_v9  ;;  %v545_v14 = vpop.f32.mrb[15].mxu0  ;;  %949 = vmatpush3.bf16.msra.mxu1 %v946_v6 }
 0x2bd   :  { %v950_v15 = vpack.c.bf16 %v559_v8, %v558_v10  ;;  %v546_v16 = vadd.f32 %v545_v14, %v418_v12 }
 0x2be   :  { %v561_v17 = vmax.f32 %v551_v13, 0.0 }
 0x2bf   :  { %v560_v18 = vmax.f32 %v546_v16, 0.0  ;;  %951 = vmatprep.subr.bf16.mxu1 %v950_v15 }
 0x2c0   :  { %953 = vmatpush3.bf16.msra.mxu1 %v950_v15 }
 0x2c1   :  { %v954_v19 = vpack.c.bf16 %v561_v17, %v560_v18 }
 0x2c3   :  { %955 = vmatprep.subr.bf16.mxu1 %v954_v19 }
 0x2c4   :  { %957 = vmatpush3.bf16.msra.mxu1 %v954_v19 }
 0x2c7   :  { %905 = vmatmul.mubr.msk.f32.vlgmr.msra.gmra.mrb[4].mxu1 %vm267_vm1, %v563_v20 }
 0x2c8   :  { %907 = vmatprep.mubr.msk.f32.mxu1 %vm267_vm1, %v564_v21 }
 0x2cb   :  { %908 = vmatmul.mubr.msk.f32.gmra.mrb[6].mxu1 %vm267_vm1, %v565_v22 }
 0x39a   :  { %v906_v27 = vpop.f32.mrb[4].mxu1 }
 0x39b   :  { %v674_v28 = vadd.f32 %v906_v27, %v578_v24  ;;  %v668_v29 = vpop.f32.mrb[5].mxu1 }
 0x39c   :  { %v669_v30 = vadd.f32 %v668_v29, %v573_v23 }
 0x39d   :  { %v688_v32 = vmax.f32 %v674_v28, 0.0 }
 0x39e   :  { %v687_v34 = vmax.f32 %v669_v30, 0.0  ;;  %v909_v35 = vpop.f32.mrb[6].mxu1 }
 0x39f   :  { %v717_v36 = vmul.f32 %v704_v33, %v688_v32  ;;  %v684_v37 = vadd.f32 %v909_v35, %v588_v26  ;;  %v678_v38 = vpop.f32.mrb[7].mxu1 }
 0x3a0   :  { %v716_v39 = vmul.f32 %v699_v31, %v687_v34  ;;  %v679_v40 = vadd.f32 %v678_v38, %v583_v25 }
 0x3a1   :  { %v690_v42 = vmax.f32 %v684_v37, 0.0 }
 0x3a2   :  { %v720_v41 = vadd.f32 %v717_v36, %v716_v39  ;;  %v689_v43 = vmax.f32 %v679_v40, 0.0 }
 0x3a3   :  { %v719_v47 = vmul.f32 %v714_v46, %v690_v42 }
 0x3a4   :  { %v718_v45 = vmul.f32 %v709_v44, %v689_v43 }
 0x3a6   :  { %v721_v48 = vadd.f32 %v720_v41, %v718_v45 }
 0x3a8   :  { %v722_v50 = vadd.f32 %v721_v48, %v719_v47 }
 0x3aa   :  { %v723_v51 = vrot.slane %v722_v50, 4 }
 0x3ac   :  { %v724_v53 = vadd.f32 %v723_v51, %v722_v50 }
 0x3ae   :  { %v725_v54 = vrot.slane %v724_v53, 2 }
 0x3b0   :  { %v726_v56 = vadd.f32 %v725_v54, %v724_v53 }
 0x3b2   :  { %v727_v58 = vrot.slane %v726_v56, 1 }
 0x3b4   :  { %v728_v60 = vadd.f32 %v727_v58, %v726_v56 }
 0x3b6   :  { %v738_v61 = vadd.f32 %v737_v59, %v728_v60 }
 0x3b8   :  { %739 = vst [vmem:[#allocation3] sm:$0x1] %v738_v61 }
 0x3b9   :  { %973 = shalt.err (!%p970_p4)
}
 0x3ba   :  { %s974_s14 = scalar_lea.hbm %s1266_s11, 16 }
 0x3bb   :  { %p975_p5 = scmp.ne.s32.totalorder %s1266_s11, %s974_s14  ;;  %p978_p6 = scmp.lt.u32.totalorder %s974_s14, %s1266_s11 }
 0x3bd   :  { %p980_p7 = pnand %p978_p6, %p975_p5 }
 0x3bf   :  { %983 = shalt.err (!%p980_p7)
}
 0x3c0   :  { %749 = dma.vmem_to_hbm [thread:$0]  %s747_s4, 16, %s1266_s11, [#allocation4]  }
 0x3c1   :  { %984 = dma.done.wait [#allocation4], 16  }
 0x3c2   :  { %985 = vsyncadd [#allocation4], 4294967280 }
 0x3c3   :  { %753 = vsyncpa [#allocation4], 1 }

</bundles_post_ra>
